<compile_context>
chip_gen: v7x
topology: tpu7x:2x2x1
jax: 0.10.0
libtpu: 0.0.40
codegen_flags: <defaults>
</compile_context>

<pallas_src>
import math

import jax
import jax.numpy as jnp
from jax.experimental import pallas as pl
from jax.experimental.pallas import tpu as pltpu

INPUT_SIZE = 784           # MNIST: 1x28x28 flattened
HIDDEN = 100
HIDDEN_PAD = 128           # lane-aligned hidden dim
OUTPUT_SIZE = 10
KW_PERCENT_ON = (0.99, 0.99)
K1 = int(round(HIDDEN * KW_PERCENT_ON[0]))   # 99
K2 = int(round(HIDDEN * KW_PERCENT_ON[1]))   # 99
COMPUTE_DTYPE = jnp.bfloat16                 # MXU operand dtype (accumulation is f32)

# The reduction-based k-winners below is exact only for k == n-1 (drop the strict
# minimum).  TODO(synk): a general k would use an iterative masked-min/max threshold
# selection (still reductions, never a per-lane roll scan).
assert K1 == HIDDEN - 1 and K2 == HIDDEN - 1, "fast k-winners path assumes k = n - 1"


def _round_up(n, m):
    return (n + m - 1) // m * m


def _kwinners_drop_min(h, valid):
    """k-winners with k = n_valid - 1 over the lanes where `valid` is True.

    Threshold = second-smallest valid value per row (== sorted[1]); keep h >= thr.
    Ties at the minimum keep everything, exactly matching the sort-threshold
    reference.  Two cross-lane min reductions + a few VPU selects, all in f32.
    """
    big = jnp.float32(3e38)
    hv = jnp.where(valid, h, big)                              # padded lanes never the min
    m1 = jnp.min(hv, axis=1, keepdims=True)                    # row minimum
    is_min = hv <= m1
    n_min = jnp.sum(is_min.astype(jnp.int32), axis=1, keepdims=True)
    m2 = jnp.min(jnp.where(is_min, big, hv), axis=1, keepdims=True)  # next distinct value
    thr = jnp.where(n_min > 1, m1, m2)                         # == sorted[1] incl. ties
    keep = jnp.logical_and(h >= thr, valid)
    return jnp.where(keep, h, jnp.float32(0.0))


def sparse_mlp_kernel(x_ref, w1_ref, b1_ref, w2_ref, b2_ref, wc_ref, bc_ref, o_ref):
    x = x_ref[...].astype(COMPUTE_DTYPE)                       # (TB, 784) f32 -> bf16 in VMEM

    # Valid-lane mask for the padded hidden dim, built once and reused by both k-winners.
    tb = x_ref.shape[0]
    col = jax.lax.broadcasted_iota(jnp.int32, (tb, HIDDEN_PAD), 1)
    valid = col < HIDDEN

    h1 = jnp.dot(x, w1_ref[...], preferred_element_type=jnp.float32) + b1_ref[...]
    h1 = _kwinners_drop_min(h1, valid)                         # (TB, HIDDEN_PAD) f32
    h2 = jnp.dot(h1.astype(COMPUTE_DTYPE), w2_ref[...],
                 preferred_element_type=jnp.float32) + b2_ref[...]
    h2 = _kwinners_drop_min(h2, valid)
    o_ref[...] = jnp.dot(h2.astype(COMPUTE_DTYPE), wc_ref[...],
                         preferred_element_type=jnp.float32) + bc_ref[...]  # (TB, 10) f32


def sparse_mnist_mlp(x, params, *, tile_b=512):
    """Forward pass. x may be (B, 1, 28, 28) or (B, 784); it is flattened like x.view(-1, ...)."""
    w1, b1, w2, b2, wc, bc = params
    batch = x.shape[0]
    x2d = x.reshape(batch, -1).astype(jnp.float32)              # reshape is a view; no HBM pass
    assert x2d.shape[1] == INPUT_SIZE

    # Batch tile: multiple of 8 sublanes, capped so the parallel batch axis keeps >= 2
    # grid steps when the batch allows (feeds both v7x TensorCores).
    batch8 = _round_up(batch, 8)
    tb = max(8, min(_round_up(tile_b, 8), batch8))
    if batch8 >= 16:
        tb = min(tb, _round_up(batch8 // 2, 8))
    batch_pad = _round_up(batch, tb)
    if batch_pad != batch:                                       # only pad when strictly needed
        x2d = jnp.pad(x2d, ((0, batch_pad - batch), (0, 0)))

    grid = (batch_pad // tb,)

    # Rough per-step VMEM budget: double-buffered x/out tiles + resident weights +
    # f32 k-winners temporaries.  Clamp to [32, 64] MiB (64 MiB = v7x physical VMEM).
    weight_bytes = (INPUT_SIZE * HIDDEN_PAD + HIDDEN_PAD * HIDDEN_PAD
                    + HIDDEN_PAD * OUTPUT_SIZE) * 2
    est = (2 * tb * INPUT_SIZE * 4
           + 2 * tb * OUTPUT_SIZE * 4
           + 2 * weight_bytes
           + 10 * tb * HIDDEN_PAD * 4)
    vmem_limit = int(min(64 * 2**20, max(32 * 2**20, 2 * est)))

    out = pl.pallas_call(
        sparse_mlp_kernel,
        out_shape=jax.ShapeDtypeStruct((batch_pad, OUTPUT_SIZE), jnp.float32),
        grid=grid,
        in_specs=[
            pl.BlockSpec((tb, INPUT_SIZE), lambda i: (i, 0)),          # x: tiled on batch
            pl.BlockSpec((INPUT_SIZE, HIDDEN_PAD), lambda i: (0, 0)),  # weights/biases: resident
            pl.BlockSpec((1, HIDDEN_PAD), lambda i: (0, 0)),
            pl.BlockSpec((HIDDEN_PAD, HIDDEN_PAD), lambda i: (0, 0)),
            pl.BlockSpec((1, HIDDEN_PAD), lambda i: (0, 0)),
            pl.BlockSpec((HIDDEN_PAD, OUTPUT_SIZE), lambda i: (0, 0)),
            pl.BlockSpec((1, OUTPUT_SIZE), lambda i: (0, 0)),
        ],
        out_specs=pl.BlockSpec((tb, OUTPUT_SIZE), lambda i: (i, 0)),
        compiler_params=pltpu.CompilerParams(
            dimension_semantics=("parallel",),
            vmem_limit_bytes=vmem_limit),
    )(x2d, w1, b1, w2, b2, wc, bc)
    return out if batch_pad == batch else out[:batch]


def init_params(key):
    """Xavier-uniform weights, zero biases (mirrors reset_parameters + xavier)."""
    def xavier_linear(k, fan_in, fan_out):
        a = math.sqrt(6.0 / (fan_in + fan_out))
        w = jax.random.uniform(k, (fan_out, fan_in), jnp.float32, -a, a)  # torch (out, in) layout
        b = jnp.zeros((fan_out,), jnp.float32)
        return w, b

    k1, k2, k3 = jax.random.split(key, 3)
    w1, b1 = xavier_linear(k1, INPUT_SIZE, HIDDEN)
    w2, b2 = xavier_linear(k2, HIDDEN, HIDDEN)
    wc, bc = xavier_linear(k3, HIDDEN, OUTPUT_SIZE)

    # Transpose to (in, out), zero-pad the hidden dim to 128 lanes, cast weights to bf16.
    w1_t = (jnp.zeros((INPUT_SIZE, HIDDEN_PAD), jnp.float32)
            .at[:, :HIDDEN].set(w1.T).astype(COMPUTE_DTYPE))
    b1_p = jnp.zeros((1, HIDDEN_PAD), jnp.float32).at[:, :HIDDEN].set(b1)
    w2_t = (jnp.zeros((HIDDEN_PAD, HIDDEN_PAD), jnp.float32)
            .at[:HIDDEN, :HIDDEN].set(w2.T).astype(COMPUTE_DTYPE))
    b2_p = jnp.zeros((1, HIDDEN_PAD), jnp.float32).at[:, :HIDDEN].set(b2)
    wc_t = (jnp.zeros((HIDDEN_PAD, OUTPUT_SIZE), jnp.float32)
            .at[:HIDDEN, :].set(wc.T).astype(COMPUTE_DTYPE))
    bc_p = bc.reshape(1, OUTPUT_SIZE)

    packed = (w1_t, b1_p, w2_t, b2_p, wc_t, bc_p)
    raw = (w1, b1, w2, b2, wc, bc)
    return packed, raw


def reference_forward(x, raw):
    """Pure-JAX reference matching the PyTorch forward (KWinners via sort threshold).

    Matmul operands are cast to the same bf16 dtype as the kernel (with f32
    accumulation) so the comparison isolates kernel/layout correctness from the
    intended mixed-precision approximation.
    """
    w1, b1, w2, b2, wc, bc = raw
    xf = x.reshape(x.shape[0], -1).astype(jnp.float32)

    def lin(a, w, b):
        return jnp.dot(a.astype(COMPUTE_DTYPE), w.T.astype(COMPUTE_DTYPE),
                       preferred_element_type=jnp.float32) + b

    def kw(h, k):
        thr = jnp.sort(h, axis=1)[:, HIDDEN - k][:, None]
        return jnp.where(h >= thr, h, 0.0)

    h1 = kw(lin(xf, w1, b1), K1)
    h2 = kw(lin(h1, w2, b2), K2)
    return lin(h2, wc, bc)


# TODO(synk): heterogeneous-dropout masks and the _activation_counts bookkeeping are
# training-time, stateful/host-RNG side effects and are not part of the inference
# forward computation; they are intentionally not reproduced in the kernel.

if __name__ == "__main__":
    key = jax.random.PRNGKey(0)
    pkey, xkey = jax.random.split(key)
    params, raw_params = init_params(pkey)

    batch = 16
    x = jax.random.normal(xkey, (batch, 1, 28, 28), jnp.float32)

    # tile_b=8 forces a 2-step batch grid so the pipelined/multi-block path is exercised.
    out = sparse_mnist_mlp(x, params, tile_b=8)
    out = jax.block_until_ready(out)

    ref = reference_forward(x, raw_params)
    assert out.shape == (batch, OUTPUT_SIZE)
    assert jnp.allclose(out, ref, rtol=1e-3, atol=1e-3), (
        f"max abs err = {jnp.max(jnp.abs(out - ref))}")

    # Ragged batch (not a multiple of the tile): exercises the host batch-pad + slice path.
    x_odd = x[:13]
    out_odd = jax.block_until_ready(sparse_mnist_mlp(x_odd, params))
    ref_odd = reference_forward(x_odd, raw_params)
    assert out_odd.shape == (13, OUTPUT_SIZE)
    assert jnp.allclose(out_odd, ref_odd, rtol=1e-3, atol=1e-3), (
        f"max abs err = {jnp.max(jnp.abs(out_odd - ref_odd))}")

    print("KERNEL_OK")
</pallas_src>

<mosaic_0001>
module attributes {stable_mosaic.version = 11 : i64} {
  func.func @sparse_mlp_kernel(%arg0: i32, %arg1: memref<8x784xf32, #tpu.memory_space<vmem>>, %arg2: memref<784x128xbf16, #tpu.memory_space<vmem>>, %arg3: memref<1x128xf32, #tpu.memory_space<vmem>>, %arg4: memref<128x128xbf16, #tpu.memory_space<vmem>>, %arg5: memref<1x128xf32, #tpu.memory_space<vmem>>, %arg6: memref<128x10xbf16, #tpu.memory_space<vmem>>, %arg7: memref<1x10xf32, #tpu.memory_space<vmem>>, %arg8: memref<8x10xf32, #tpu.memory_space<vmem>>) attributes {dimension_semantics = [#tpu.dimension_semantics<parallel>], iteration_bounds = array<i64: 2>, scalar_prefetch = 0 : i64, scratch_operands = 0 : i64, tpu.core_type = #tpu.core_type<tc>, window_params = [{transform_indices = @transform_0, window_bounds = array<i64: 8, 784>}, {pipeline_mode = #tpu.pipeline_mode<synchronous>, transform_indices = @transform_1, window_bounds = array<i64: 784, 128>}, {pipeline_mode = #tpu.pipeline_mode<synchronous>, transform_indices = @transform_2, window_bounds = array<i64: 1, 128>}, {pipeline_mode = #tpu.pipeline_mode<synchronous>, transform_indices = @transform_3, window_bounds = array<i64: 128, 128>}, {pipeline_mode = #tpu.pipeline_mode<synchronous>, transform_indices = @transform_4, window_bounds = array<i64: 1, 128>}, {pipeline_mode = #tpu.pipeline_mode<synchronous>, transform_indices = @transform_5, window_bounds = array<i64: 128, 10>}, {pipeline_mode = #tpu.pipeline_mode<synchronous>, transform_indices = @transform_6, window_bounds = array<i64: 1, 10>}, {transform_indices = @transform_7, window_bounds = array<i64: 8, 10>}]} {
    %c0 = arith.constant 0 : index
    %c0_0 = arith.constant 0 : index
    %0 = vector.load %arg1[%c0, %c0_0] : memref<8x784xf32, #tpu.memory_space<vmem>>, vector<8x784xf32>
    %1 = arith.truncf %0 : vector<8x784xf32> to vector<8x784xbf16>
    %2 = tpu.iota {dimensions = array<i32: 1>} : vector<8x128xi32>
    %c100_i32 = arith.constant 100 : i32
    %3 = vector.broadcast %c100_i32 : i32 to vector<8x128xi32>
    %4 = arith.cmpi slt, %2, %3 : vector<8x128xi32>
    %c0_1 = arith.constant 0 : index
    %c0_2 = arith.constant 0 : index
    %5 = vector.load %arg2[%c0_1, %c0_2] : memref<784x128xbf16, #tpu.memory_space<vmem>>, vector<784x128xbf16>
    %cst = arith.constant dense<0.000000e+00> : vector<8x128xf32>
    %6 = tpu.matmul %1, %5, %cst {dimension_numbers = #tpu.dot_dimension_numbers<[1], [0], [0], [1], [0, 0, 1, 1], [], []>} : vector<8x784xbf16>, vector<784x128xbf16>, vector<8x128xf32> -> vector<8x128xf32>
    %c0_3 = arith.constant 0 : index
    %c0_4 = arith.constant 0 : index
    %7 = vector.load %arg3[%c0_3, %c0_4] : memref<1x128xf32, #tpu.memory_space<vmem>>, vector<1x128xf32>
    %8 = vector.broadcast %7 : vector<1x128xf32> to vector<8x128xf32>
    %9 = arith.addf %6, %8 : vector<8x128xf32>
    %cst_5 = arith.constant 3.000000e+38 : f32
    %10 = vector.broadcast %cst_5 : f32 to vector<8x128xf32>
    %11 = arith.select %4, %9, %10 : vector<8x128xi1>, vector<8x128xf32>
    %cst_6 = arith.constant dense<0x7F800000> : vector<8xf32>
    %12 = vector.multi_reduction <minimumf>, %11, %cst_6 [1] : vector<8x128xf32> to vector<8xf32>
    %13 = vector.shape_cast %12 : vector<8xf32> to vector<8x1xf32>
    %14 = vector.broadcast %13 : vector<8x1xf32> to vector<8x128xf32>
    %15 = arith.cmpf ole, %11, %14 : vector<8x128xf32>
    %16 = arith.extui %15 : vector<8x128xi1> to vector<8x128xi32>
    %cst_7 = arith.constant dense<0> : vector<8xi32>
    %17 = vector.multi_reduction <add>, %16, %cst_7 [1] : vector<8x128xi32> to vector<8xi32>
    %18 = vector.shape_cast %17 : vector<8xi32> to vector<8x1xi32>
    %cst_8 = arith.constant 3.000000e+38 : f32
    %19 = vector.broadcast %cst_8 : f32 to vector<8x128xf32>
    %20 = arith.select %15, %19, %11 : vector<8x128xi1>, vector<8x128xf32>
    %cst_9 = arith.constant dense<0x7F800000> : vector<8xf32>
    %21 = vector.multi_reduction <minimumf>, %20, %cst_9 [1] : vector<8x128xf32> to vector<8xf32>
    %22 = vector.shape_cast %21 : vector<8xf32> to vector<8x1xf32>
    %c1_i32 = arith.constant 1 : i32
    %23 = vector.broadcast %c1_i32 : i32 to vector<8x1xi32>
    %24 = arith.cmpi sgt, %18, %23 : vector<8x1xi32>
    %25 = arith.select %24, %13, %22 : vector<8x1xi1>, vector<8x1xf32>
    %26 = vector.broadcast %25 : vector<8x1xf32> to vector<8x128xf32>
    %27 = arith.cmpf oge, %9, %26 : vector<8x128xf32>
    %28 = arith.andi %27, %4 : vector<8x128xi1>
    %cst_10 = arith.constant 0.000000e+00 : f32
    %29 = vector.broadcast %cst_10 : f32 to vector<8x128xf32>
    %30 = arith.select %28, %9, %29 : vector<8x128xi1>, vector<8x128xf32>
    %31 = arith.truncf %30 : vector<8x128xf32> to vector<8x128xbf16>
    %c0_11 = arith.constant 0 : index
    %c0_12 = arith.constant 0 : index
    %32 = vector.load %arg4[%c0_11, %c0_12] : memref<128x128xbf16, #tpu.memory_space<vmem>>, vector<128x128xbf16>
    %cst_13 = arith.constant dense<0.000000e+00> : vector<8x128xf32>
    %33 = tpu.matmul %31, %32, %cst_13 {dimension_numbers = #tpu.dot_dimension_numbers<[1], [0], [0], [1], [0, 0, 1, 1], [], []>} : vector<8x128xbf16>, vector<128x128xbf16>, vector<8x128xf32> -> vector<8x128xf32>
    %c0_14 = arith.constant 0 : index
    %c0_15 = arith.constant 0 : index
    %34 = vector.load %arg5[%c0_14, %c0_15] : memref<1x128xf32, #tpu.memory_space<vmem>>, vector<1x128xf32>
    %35 = vector.broadcast %34 : vector<1x128xf32> to vector<8x128xf32>
    %36 = arith.addf %33, %35 : vector<8x128xf32>
    %cst_16 = arith.constant 3.000000e+38 : f32
    %37 = vector.broadcast %cst_16 : f32 to vector<8x128xf32>
    %38 = arith.select %4, %36, %37 : vector<8x128xi1>, vector<8x128xf32>
    %cst_17 = arith.constant dense<0x7F800000> : vector<8xf32>
    %39 = vector.multi_reduction <minimumf>, %38, %cst_17 [1] : vector<8x128xf32> to vector<8xf32>
    %40 = vector.shape_cast %39 : vector<8xf32> to vector<8x1xf32>
    %41 = vector.broadcast %40 : vector<8x1xf32> to vector<8x128xf32>
    %42 = arith.cmpf ole, %38, %41 : vector<8x128xf32>
    %43 = arith.extui %42 : vector<8x128xi1> to vector<8x128xi32>
    %cst_18 = arith.constant dense<0> : vector<8xi32>
    %44 = vector.multi_reduction <add>, %43, %cst_18 [1] : vector<8x128xi32> to vector<8xi32>
    %45 = vector.shape_cast %44 : vector<8xi32> to vector<8x1xi32>
    %cst_19 = arith.constant 3.000000e+38 : f32
    %46 = vector.broadcast %cst_19 : f32 to vector<8x128xf32>
    %47 = arith.select %42, %46, %38 : vector<8x128xi1>, vector<8x128xf32>
    %cst_20 = arith.constant dense<0x7F800000> : vector<8xf32>
    %48 = vector.multi_reduction <minimumf>, %47, %cst_20 [1] : vector<8x128xf32> to vector<8xf32>
    %49 = vector.shape_cast %48 : vector<8xf32> to vector<8x1xf32>
    %c1_i32_21 = arith.constant 1 : i32
    %50 = vector.broadcast %c1_i32_21 : i32 to vector<8x1xi32>
    %51 = arith.cmpi sgt, %45, %50 : vector<8x1xi32>
    %52 = arith.select %51, %40, %49 : vector<8x1xi1>, vector<8x1xf32>
    %53 = vector.broadcast %52 : vector<8x1xf32> to vector<8x128xf32>
    %54 = arith.cmpf oge, %36, %53 : vector<8x128xf32>
    %55 = arith.andi %54, %4 : vector<8x128xi1>
    %cst_22 = arith.constant 0.000000e+00 : f32
    %56 = vector.broadcast %cst_22 : f32 to vector<8x128xf32>
    %57 = arith.select %55, %36, %56 : vector<8x128xi1>, vector<8x128xf32>
    %58 = arith.truncf %57 : vector<8x128xf32> to vector<8x128xbf16>
    %c0_23 = arith.constant 0 : index
    %c0_24 = arith.constant 0 : index
    %59 = vector.load %arg6[%c0_23, %c0_24] : memref<128x10xbf16, #tpu.memory_space<vmem>>, vector<128x10xbf16>
    %cst_25 = arith.constant dense<0.000000e+00> : vector<8x10xf32>
    %60 = tpu.matmul %58, %59, %cst_25 {dimension_numbers = #tpu.dot_dimension_numbers<[1], [0], [0], [1], [0, 0, 1, 1], [], []>} : vector<8x128xbf16>, vector<128x10xbf16>, vector<8x10xf32> -> vector<8x10xf32>
    %c0_26 = arith.constant 0 : index
    %c0_27 = arith.constant 0 : index
    %61 = vector.load %arg7[%c0_26, %c0_27] : memref<1x10xf32, #tpu.memory_space<vmem>>, vector<1x10xf32>
    %62 = vector.broadcast %61 : vector<1x10xf32> to vector<8x10xf32>
    %63 = arith.addf %60, %62 : vector<8x10xf32>
    %c0_28 = arith.constant 0 : index
    %c0_29 = arith.constant 0 : index
    %64 = vector.load %arg8[%c0_28, %c0_29] : memref<8x10xf32, #tpu.memory_space<vmem>>, vector<8x10xf32>
    tpu.vector_store %arg8[%c0_28, %c0_29], %63 {strides = array<i32>} : memref<8x10xf32, #tpu.memory_space<vmem>>, vector<8x10xf32>,
    return
  }
  func.func @transform_0(%arg0: i32) -> (i32, i32) {
    %c0_i32 = arith.constant 0 : i32
    %c0_i32_0 = arith.constant 0 : i32
    return %arg0, %c0_i32 : i32, i32
  }
  func.func @transform_1(%arg0: i32) -> (i32, i32) {
    %c0_i32 = arith.constant 0 : i32
    %c0_i32_0 = arith.constant 0 : i32
    %c0_i32_1 = arith.constant 0 : i32
    return %c0_i32, %c0_i32_0 : i32, i32
  }
  func.func @transform_2(%arg0: i32) -> (i32, i32) {
    %c0_i32 = arith.constant 0 : i32
    %c0_i32_0 = arith.constant 0 : i32
    %c0_i32_1 = arith.constant 0 : i32
    return %c0_i32, %c0_i32_0 : i32, i32
  }
  func.func @transform_3(%arg0: i32) -> (i32, i32) {
    %c0_i32 = arith.constant 0 : i32
    %c0_i32_0 = arith.constant 0 : i32
    %c0_i32_1 = arith.constant 0 : i32
    return %c0_i32, %c0_i32_0 : i32, i32
  }
  func.func @transform_4(%arg0: i32) -> (i32, i32) {
    %c0_i32 = arith.constant 0 : i32
    %c0_i32_0 = arith.constant 0 : i32
    %c0_i32_1 = arith.constant 0 : i32
    return %c0_i32, %c0_i32_0 : i32, i32
  }
  func.func @transform_5(%arg0: i32) -> (i32, i32) {
    %c0_i32 = arith.constant 0 : i32
    %c0_i32_0 = arith.constant 0 : i32
    %c0_i32_1 = arith.constant 0 : i32
    return %c0_i32, %c0_i32_0 : i32, i32
  }
  func.func @transform_6(%arg0: i32) -> (i32, i32) {
    %c0_i32 = arith.constant 0 : i32
    %c0_i32_0 = arith.constant 0 : i32
    %c0_i32_1 = arith.constant 0 : i32
    return %c0_i32, %c0_i32_0 : i32, i32
  }
  func.func @transform_7(%arg0: i32) -> (i32, i32) {
    %c0_i32 = arith.constant 0 : i32
    %c0_i32_0 = arith.constant 0 : i32
    return %arg0, %c0_i32 : i32, i32
  }
}

</mosaic_0001>

<bundles_post_ra>
// kernel: tpu_custom_call.1
= control target key start
LH: loop header
LB: loop body
LE: loop exit
PB: predicated region body
PF: predicated region fallthrough
CT: control target
= control target key end

     0   :  { %s2085_s0 = inlined_call_operand.hbm [shape: f32[16,784], index: 0, kind: input, shape index: {}]   ;;  %s2086_s1 = inlined_call_operand.hbm [shape: bf16[784,128], index: 1, kind: input, shape index: {}]   ;;  %s2087_s2 = inlined_call_operand.vmem [shape: f32[1,128], index: 2, kind: input, shape index: {}]   ;;  %s2088_s3 = inlined_call_operand.vmem [shape: bf16[128,128], index: 3, kind: input, shape index: {}]   ;;  %s2089_s4 = inlined_call_operand.vmem [shape: f32[1,128], index: 4, kind: input, shape index: {}]   ;;  %s2090_s5 = inlined_call_operand.vmem [shape: bf16[128,10], index: 5, kind: input, shape index: {}]   ;;  %s2091_s6 = inlined_call_operand.vmem [shape: f32[1,10], index: 6, kind: input, shape index: {}]   ;;  %s2092_s7 = inlined_call_operand.hbm [shape: f32[16,10], index: 7, kind: output, shape index: {}]  }
   0x1   :  { %2096 = sst [smem:[#allocation11_spill]] %s2086_s1 }
   0x2   :  { %12 = vsyncpa [#allocation3], 0 }
   0x3   :  { %14 = vsyncpa [#allocation3 + $0x1], 0 }
   0x4   :  { %15 = vsyncpa [#allocation6], 0 }
   0x5   :  { %16 = vsyncpa [#allocation4], 0 }
   0x6   :  { %18 = vsyncpa [#allocation4 + $0x1], 0  ;;  %s1788_s24 = smov 0   ;;  %s1790_s25 = smov 0  }
   0x7   :  { %s1792_s26 = smov 0   ;;  %s1794_s27 = smov 0  }
   0x8 LB: > { %s1809_s28 = sadd.s32 4294967295, %s1738_s27   ;;  %s1261_s29 = sadd.s32 4294967294, %s1738_s27   ;;  %s1738_s27 = sphi %s1794_s27, %s2114_s27   ;;  %s1734_s26 = sphi %s1792_s26, %s2113_s26   ;;  %s1730_s25 = sphi %s1790_s25, %s2112_s25   ;;  %s1726_s24 = sphi %s1788_s24, %s2111_s24  }
   0x9   : > { %p44_p0 = scmp.ne.s32.totalorder %s1730_s25, %s1726_s24  ;;  %p2093_p1 = scmp.eq.s32.totalorder %s1809_s28, 0 }
   0xa   : > { %p200_p3 = scmp.eq.s32.totalorder %s1261_s29, 1  ;;  %p1262_p5 = scmp.ge.s32.totalorder %s1738_s27, 1 }
   0xb   : > { %p1818_p4 = por %p2093_p1, %p44_p0  ;;  %p207_p7 = scmp.lt.s32.totalorder %s1738_s27, 3 }
   0xc   : > { %p1823_p6 = por %p200_p3, %p44_p0  ;;  %s1740_s10 = smov [#allocation5]  }
   0xd   : > { %s2097_s30 = scalar_select %p1818_p4, 1, 0 }
   0xe   : > { %s2098_s8 = scalar_select %p1823_p6, 1, 0 }
   0xf   : > { %p1828_p8 = pnand %p1262_p5, %p207_p7  ;;  %s219_s11 = sshll.u32 %s1740_s10, 4  ;;  %s1832_s11 = int_to_ptr.vmem [resolvable:$true] %s219_s11 }
  0x10   : > { %s1844_s13 = sadd.s32 1, %s1738_s27   ;;  %s31_s14 = sadd.s32 1, %s1734_s26 }
  0x11   : > { %s2099_s9 = scalar_select %p1828_p8, 1, 0 }
  0x12   : > { %p1491_p9 = pneg %p1828_p8  ;;  %s28_s15 = ssub.s32 %s1738_s27, %s1844_s13 }
  0x13   : > { %s2101_s1 = sld [smem:[#allocation11_spill]] }
  0x14   : > { %p1839_p11 = pnand %p1491_p9, %p2093_p1 }
  0x16   : > { %p1612_p13 = pneg %p1839_p11 }
  0x19   : > { %s1610_s18 = scalar_lea.hbm %s2101_s1, 6272 }
  0x1a   : > { %p1611_p12 = scmp.ne.s32.totalorder %s2101_s1, %s1610_s18  ;;  %p1617_p5 = scmp.lt.u32.totalorder %s1610_s18, %s2101_s1 }
  0x1c   : > { %p1613_p0 = pnand %p1612_p13, %p1611_p12 }
  0x1e   : > { %p1614_p3 = pneg %p1613_p0 }
  0x20   : > { %p1619_p7 = pnand %p1617_p5, %p1614_p3 }
  0x22   : > { %1622 = shalt.err (!%p1619_p7)
}
  0x23   : > { %s1623_s23 = scalar_lea.vmem %s1832_s11, 6272  ;;  %p1631_p2 = scmp.lt.s32.totalorder %s1832_s11, %s1832_s11 }
  0x24   : > { %p1624_p9 = scmp.ne.s32.totalorder %s1832_s11, %s1623_s23  ;;  %p1632_p6 = scmp.lt.s32.totalorder %s1623_s23, %s1623_s23 }
  0x26   : > { %p1626_p10 = pnand %p1624_p9, %p1612_p13  ;;  %p1633_p4 = por %p1632_p6, %p1631_p2 }
  0x28   : > { %p1627_p1 = pneg %p1626_p10 }
  0x2a   : > { %p1634_p8 = pnand %p1633_p4, %p1627_p1 }
  0x2c   : > { %1637 = shalt.err (!%p1634_p8)
}
  0x2d   : > { %s1741_s29 = smov 64   ;;  %s1742_s10 = smov 4  }
  0x2e   : > { %1494 = dma.hbm_to_vmem [thread:$0]  (!%p1839_p11), %s2101_s1, 6272, %s1832_s11, [#allocation6], %s1741_s29, %s1741_s29, %s1742_s10  }
  0x2f   : > { %p29_p2 = scmp.eq.s32.totalorder %s28_s15, 0  ;;  %p38_p1 = scmp.ne.s32.totalorder %s1734_s26, %s1730_s25 }
  0x30   : > { %p39_p4 = scmp.eq.s32.totalorder %s1738_s27, 0  ;;  %p1504_p6 = scmp.lt.s32.totalorder %s1738_s27, 2 }
  0x31   : > { %s1875_s18 = scalar_select %p29_p2, %s1734_s26, %s31_s14  }
  0x32   : > { %p40_p8 = por %p39_p4, %p38_p1  ;;  %p2102_p10 = scmp.eq.s32.totalorder %s1809_s28, 1 }
  0x33   : > { %s248_s20 = sand.u32 1, %s1734_s26   ;;  %s1481_s21 = smul.u32 896, %s1738_s27 }
  0x34   : > { %p1879_p12 = por %p2102_p10, %p38_p1  ;;  %s1480_s22 = smul.u32 56, %s248_s20 }
  0x35   : > { %p1885_p13 = pnand %p1504_p6, %p40_p8  ;;  %s1892_s14 = scalar_lea.hbm %s2085_s0, %s1481_s21 }
  0x36   : > { %s252_s23 = scalar_lea.vmem [#allocation2], %s1480_s22  ;;  %s249_s10 = scalar_lea.sflag [#allocation3], %s248_s20 }
  0x37   : > { %s260_s29 = sshll.u32 %s252_s23, 4  ;;  %s1638_s16 = scalar_lea.hbm %s1892_s14, 896  ;;  %s1894_s29 = int_to_ptr.vmem [resolvable:$true] %s260_s29 }
  0x38   : > { %p1639_p11 = scmp.ne.s32.totalorder %s1892_s14, %s1638_s16  ;;  %p1640_p0 = pneg %p1885_p13 }
  0x39   : > { %s1643_s11 = scalar_lea.hbm %s2085_s0, 1792  ;;  %p1644_p7 = scmp.lt.u32.totalorder %s1892_s14, %s2085_s0 }
  0x3a   : > { %p1641_p3 = pnand %p1640_p0, %p1639_p11  ;;  %p1645_p9 = scmp.lt.u32.totalorder %s1643_s11, %s1638_s16 }
  0x3b   : > { %p1647_p1 = scmp.lt.u32.totalorder %s1638_s16, %s1892_s14 }
  0x3c   : > { %p1642_p5 = pneg %p1641_p3  ;;  %p1646_p2 = por %p1645_p9, %p1644_p7 }
  0x3e   : > { %p1648_p4 = por %p1647_p1, %p1646_p2 }
  0x40   : > { %p1649_p6 = pnand %p1648_p4, %p1642_p5 }
  0x42   : > { %1652 = shalt.err (!%p1649_p6)
}
  0x43   : > { %s1653_s20 = scalar_lea.vmem %s1894_s29, 896  ;;  %s1743_s22 = smov [#allocation2]  }
  0x44   : > { %p1654_p8 = scmp.ne.s32.totalorder %s1894_s29, %s1653_s20  ;;  %s1658_s23 = sshll.u32 %s1743_s22, 4  ;;  %s1659_s23 = int_to_ptr.vmem [resolvable:$false] %s1658_s23 }
  0x45   : > { %s1660_s1 = scalar_lea.vmem %s1659_s23, 1792  ;;  %p1661_p3 = scmp.lt.s32.totalorder %s1894_s29, %s1659_s23 }
  0x46   : > { %p1656_p10 = pnand %p1654_p8, %p1640_p0  ;;  %p1662_p7 = scmp.lt.s32.totalorder %s1660_s1, %s1653_s20 }
  0x48   : > { %p1657_p11 = pneg %p1656_p10  ;;  %p1663_p9 = por %p1662_p7, %p1661_p3 }
  0x4a   : > { %p1664_p2 = pnand %p1663_p9, %p1657_p11 }
  0x4c   : > { %1667 = shalt.err (!%p1664_p2)
}
  0x4d   : > { %1498 = dma.hbm_to_vmem [thread:$0]  (!%p1885_p13), %s1892_s14, 896, %s1894_s29, %s249_s10  }
  0x4e   : > { %p2105_p5 = scmp.ne.s32.totalorder %s2099_s9, 0 }
  0x4f   : > { %s1924_s16 = sand.u32 (!%p2105_p5), 1, %s1730_s25   ;;  %p2106_p0 = scmp.ne.s32.totalorder (!%p2105_p5), %s2097_s30, 0 }
  0x50   : > { %269 = sbr.rel (%p2105_p5) target bundleno = 1421 (0x58d), region = 48  ;;  %s272_s21 = scalar_lea.sflag (!%p2105_p5), [#allocation3], %s1924_s16 }
  0x51   : > { %s1482_s17 = smul.u32 (!%p2105_p5), 56, %s1924_s16 }
  0x53   : > { %s1928_s11 = scalar_lea.vmem (!%p2105_p5), [#allocation2], %s1482_s17 }
  0x57   : > { %1713 = dma.done.wait (%p2106_p0), %s272_s21, 896  }
  0x58   : > { %1715 = vsyncadd (%p2106_p0), %s272_s21, 4294966400  ;;  %p2107_p13 = scmp.eq.s32.totalorder %s1809_s28, 0 }
  0x5a   : > { %1717 = dma.done.wait (%p2107_p13), [#allocation6], 6272   ;;  %p2108_p1 = pmov %p2107_p13 }
  0x5b   : > { %v1545_v0 = vld [vmem:[#allocation5 + $0x40] sm:$0xff]   ;;  %v1549_v4 = vld [vmem:[#allocation5 + $0x48] sm:$0xff]   ;;  %v1553_v8 = vld [vmem:[#allocation5 + $0x50] sm:$0xff]   ;;  %v1744_v44 = vmov 0.0   ;;  %vm1745_vm0 = vmmov 0   ;;  %vm727_vm1 = vcmask 130048  }
  0x5c   : > { %1719 = vsyncadd (%p2108_p1), [#allocation6], 4294961024  ;;  %v1546_v1 = vld [vmem:[#allocation5] sm:$0xff]   ;;  %1348 = vmatprep.subr.bf16.mxu0 %v1545_v0  ;;  %v1550_v5 = vld [vmem:[#allocation5 + $0x8] sm:$0xff]   ;;  %s1268_s22 = sshll.u32 %s1924_s16, 3  ;;  %s1345_s17 = sshll.u32 %s1809_s28, 7 }
  0x5d   : > { %v1547_v2 = vld [vmem:[#allocation5 + $0xc0] sm:$0xff]   ;;  %1349 = vmatpush3.bf16.msra.mxu0 %v1546_v1  ;;  %v1551_v6 = vld [vmem:[#allocation5 + $0xc8] sm:$0xff]   ;;  %v1554_v9 = vld [vmem:[#allocation5 + $0x10] sm:$0xff]   ;;  %s309_s21 = scalar_lea.vmem [#allocation7], %s1268_s22  ;;  %vm1165_vm13 = vcmask 80896   ;;  %s2041_s12 = scalar_lea.hbm %s2092_s7, %s1345_s17 }
  0x5e   : > { %v1548_v3 = vld [vmem:[#allocation5 + $0x80] sm:$0xff]   ;;  %1370 = vmatprep.subr.bf16.mxu1 %v1547_v2  ;;  %1350 = vmatprep.subr.bf16.mxu0 %v1549_v4  ;;  %v1552_v7 = vld [vmem:[#allocation5 + $0x88] sm:$0xff]   ;;  %v1555_v10 = vld [vmem:[#allocation5 + $0xd0] sm:$0xff]   ;;  %s1168_s28 = scalar_lea.sflag [#allocation4], %s1924_s16  ;;  %s1747_s29 = smov [#allocation7]  }
  0x5f   : > { %1371 = vmatpush3.bf16.msra.mxu1 %v1548_v3  ;;  %v1556_v11 = vld [vmem:[#allocation5 + $0x90] sm:$0xff]   ;;  %v1557_v12 = vld [vmem:[#allocation5 + $0x58] sm:$0xff]   ;;  %v1561_v16 = vld [vmem:[#allocation5 + $0x60] sm:$0xff]   ;;  %s1672_s10 = sshll.u32 %s1747_s29, 4  ;;  %s1673_s10 = int_to_ptr.vmem [resolvable:$false] %s1672_s10 }
  0x60   : > { %1372 = vmatprep.subr.bf16.mxu1 %v1551_v6  ;;  %v1558_v13 = vld [vmem:[#allocation5 + $0x18] sm:$0xff]   ;;  %v1562_v17 = vld [vmem:[#allocation5 + $0x20] sm:$0xff]   ;;  %v1565_v20 = vld [vmem:[#allocation5 + $0x68] sm:$0xff]   ;;  %s1674_s15 = scalar_lea.vmem %s1673_s10, 256 }
  0x61   : > { %1351 = vmatpush3.bf16.msra.mxu0 %v1550_v5  ;;  %v1559_v14 = vld [vmem:[#allocation5 + $0xd8] sm:$0xff]   ;;  %v1563_v18 = vld [vmem:[#allocation5 + $0xe0] sm:$0xff]   ;;  %v1566_v21 = vld [vmem:[#allocation5 + $0x28] sm:$0xff]  }
  0x62   : > { %1352 = vmatprep.subr.bf16.mxu0 %v1553_v8  ;;  %v1560_v15 = vld [vmem:[#allocation5 + $0x98] sm:$0xff]   ;;  %v1564_v19 = vld [vmem:[#allocation5 + $0xa0] sm:$0xff]   ;;  %v1567_v22 = vld [vmem:[#allocation5 + $0xe8] sm:$0xff]  }
  0x63   : > { %1373 = vmatpush3.bf16.msra.mxu1 %v1552_v7  ;;  %v1568_v23 = vld [vmem:[#allocation5 + $0xa8] sm:$0xff]   ;;  %v1569_v24 = vld [vmem:[#allocation5 + $0x70] sm:$0xff]   ;;  %v1573_v28 = vld [vmem:[#allocation5 + $0x78] sm:$0xff]  }
  0x64   : > { %1374 = vmatprep.subr.bf16.mxu1 %v1555_v10  ;;  %v1570_v25 = vld [vmem:[#allocation5 + $0x30] sm:$0xff]   ;;  %v1574_v29 = vld [vmem:[#allocation5 + $0x38] sm:$0xff]   ;;  %v1577_v36 = vld [vmem:[#allocation5 + $0x140] sm:$0xff]  }
  0x65   : > { %1353 = vmatpush3.bf16.msra.mxu0 %v1554_v9  ;;  %v1571_v26 = vld [vmem:[#allocation5 + $0xf0] sm:$0xff]   ;;  %v1575_v30 = vld [vmem:[#allocation5 + $0xf8] sm:$0xff]   ;;  %v314_v37 = vld [vmem:[%s1928_s11 + $0x18] sm:$0xff] }
  0x66   : > { %1354 = vmatprep.subr.bf16.mxu0 %v1557_v12  ;;  %v1572_v27 = vld [vmem:[#allocation5 + $0xb0] sm:$0xff]   ;;  %v1576_v33 = vld [vmem:[#allocation5 + $0xb8] sm:$0xff]   ;;  %v321_v38 = vpack.c.bf16 %v314_v37, %v314_v37  ;;  %v1578_v39 = vld [vmem:[#allocation5 + $0x100] sm:$0xff]  }
  0x67   : > { %1375 = vmatpush3.bf16.msra.mxu1 %v1556_v11  ;;  %v312_v31 = vld [vmem:[%s1928_s11 + $0x8] sm:$0xff]  ;;  %v311_v34 = vld [vmem:[%s1928_s11] sm:$0xff]  ;;  %v313_v40 = vld [vmem:[%s1928_s11 + $0x10] sm:$0xff] }
  0x68   : > { %1376 = vmatprep.subr.bf16.mxu1 %v1559_v14  ;;  %v319_v32 = vpack.c.bf16 %v312_v31, %v312_v31  ;;  %v318_v35 = vpack.c.bf16 %v311_v34, %v311_v34  ;;  %803 = vmatprep.mubr.bf16.mxu1 %v321_v38  ;;  %v320_v41 = vpack.c.bf16 %v313_v40, %v313_v40  ;;  %v1579_v42 = vld [vmem:[#allocation5 + $0x148] sm:$0xff]   ;;  %v1581_v45 = vld [vmem:[#allocation5 + $0x150] sm:$0xff]   ;;  %v1583_v47 = vld [vmem:[#allocation5 + $0x158] sm:$0xff]  }
  0x69   : > { %1355 = vmatpush3.bf16.msra.mxu0 %v1558_v13  ;;  %v1580_v43 = vld [vmem:[#allocation5 + $0x108] sm:$0xff]   ;;  %v1582_v46 = vld [vmem:[#allocation5 + $0x110] sm:$0xff]   ;;  %v1584_v48 = vld [vmem:[#allocation5 + $0x118] sm:$0xff]  }
  0x6a   : > { %1356 = vmatprep.subr.bf16.mxu0 %v1561_v16  ;;  %763 = vmatprep.mubr.bf16.mxu0 %v319_v32  ;;  %v1585_v49 = vld [vmem:[#allocation5 + $0x160] sm:$0xff]   ;;  %v1587_v51 = vld [vmem:[#allocation5 + $0x168] sm:$0xff]   ;;  %v316_v54 = vld [vmem:[%s1928_s11 + $0x28] sm:$0xff] }
  0x6b   : > { %1377 = vmatpush3.bf16.msra.mxu1 %v1560_v15  ;;  %v1586_v50 = vld [vmem:[#allocation5 + $0x120] sm:$0xff]   ;;  %v1588_v52 = vld [vmem:[#allocation5 + $0x128] sm:$0xff]   ;;  %v1589_v55 = vld [vmem:[#allocation5 + $0x170] sm:$0xff]   ;;  %v323_v56 = vpack.c.bf16 %v316_v54, %v316_v54 }
  0x6c   : > { %1378 = vmatprep.subr.bf16.mxu1 %v1563_v18  ;;  %v1593_v53 = vld [vmem:[#allocation5 + $0x180] sm:$0xff]   ;;  %v1590_v59 = vld [vmem:[#allocation5 + $0x130] sm:$0xff]   ;;  %v1591_v60 = vld [vmem:[#allocation5 + $0x178] sm:$0xff]  }
  0x6d   : > { %1357 = vmatpush3.bf16.msra.mxu0 %v1562_v17  ;;  %v317_v57 = vld [vmem:[%s1928_s11 + $0x30] sm:$0xff]  ;;  %v315_v62 = vld [vmem:[%s1928_s11 + $0x20] sm:$0xff]  ;;  %v325_v17 = vlaneseq  ;;  %s1181_s11 = sshll.u32 %s309_s21, 4  ;;  %s2043_s11 = int_to_ptr.vmem [resolvable:$true] %s1181_s11 }
  0x6e   : > { %1358 = vmatprep.subr.bf16.mxu0 %v1565_v20  ;;  %v324_v58 = vpack.c.bf16 %v317_v57, %v317_v57  ;;  %v1592_v61 = vld [vmem:[#allocation5 + $0x138] sm:$0xff]   ;;  %v322_v63 = vpack.c.bf16 %v315_v62, %v315_v62  ;;  %v1269_v1 = vld [vmem:[%s2087_s2] ss:$0 sm:$0xff]  ;;  %v1604_v62 = vld [vmem:[%s2090_s5 + $0x10] sm:$0xff]   ;;  %s1668_s14 = scalar_lea.vmem %s2043_s11, 128  ;;  %p1675_p10 = scmp.lt.s32.totalorder %s2043_s11, %s1673_s10 }
  0x6f   : > { %1379 = vmatpush3.bf16.msra.mxu1 %v1564_v19  ;;  %v1957_v20 = vand.u32 127, %v325_v17  ;;  %v1598_v31 = vld [vmem:[%s2088_s3 + $0x20] sm:$0xff]   ;;  %v1599_v40 = vld [vmem:[%s2088_s3 + $0x28] sm:$0xff]   ;;  %p1669_p4 = scmp.ne.s32.totalorder %s2043_s11, %s1668_s14  ;;  %p1676_p11 = scmp.lt.s32.totalorder %s1674_s15, %s1668_s14 }
  0x70   : > { %1380 = vmatprep.subr.bf16.mxu1 %v1567_v22 }
  0x71   : > { %1359 = vmatpush3.bf16.msra.mxu0 %v1566_v21  ;;  %vm327_vm2 = vcmp.lt.s32.totalorder %v1957_v20, 100  ;;  %p1670_p6 = pnand %p1669_p4, %p1879_p12  ;;  %p1677_p3 = por %p1676_p11, %p1675_p10 }
  0x72   : > { %1360 = vmatprep.subr.bf16.mxu0 %v1569_v24 }
  0x73   : > { %1381 = vmatpush3.bf16.msra.mxu1 %v1568_v23  ;;  %p1671_p8 = pneg %p1670_p6 }
  0x74   : > { %1382 = vmatprep.subr.bf16.mxu1 %v1571_v26 }
  0x75   : > { %1361 = vmatpush3.bf16.msra.mxu0 %v1570_v25  ;;  %p1678_p7 = pnand %p1677_p3, %p1671_p8 }
  0x76   : > { %1362 = vmatprep.subr.bf16.mxu0 %v1573_v28  ;;  %v1595_v28 = vld [vmem:[%s2088_s3 + $0x8] sm:$0xff]  }
  0x77   : > { %1383 = vmatpush3.bf16.msra.mxu1 %v1572_v27  ;;  %v1594_v27 = vld [vmem:[%s2088_s3] sm:$0xff]  }
  0x78   : > { %1384 = vmatprep.subr.bf16.mxu1 %v1575_v30  ;;  %v1597_v30 = vld [vmem:[%s2088_s3 + $0x18] sm:$0xff]  }
  0x79   : > { %1363 = vmatpush3.bf16.msra.mxu0 %v1574_v29  ;;  %v1596_v29 = vld [vmem:[%s2088_s3 + $0x10] sm:$0xff]  }
  0x7a   : > { %1392 = vmatprep.subr.bf16.mxu0 %v1577_v36 }
  0x7b   : > { %1385 = vmatpush3.bf16.msra.mxu1 %v1576_v33  ;;  %v1746_v33 = vmov 0  }
  0x7c   : > { %764 = vmatmul.mubr.bf16.vlgmr.msra.gmra.mrb[0].mxu0 %v318_v35  ;;  %1434 = vmatprep.subr.bf16.mxu1 %v1744_v44 }
  0x7d   : > { %1393 = vmatpush3.bf16.msra.mxu0 %v1578_v39  ;;  %843 = vmatprep.mubr.bf16.mxu0 %v323_v56 }
  0x7e   : > { %804 = vmatmul.mubr.bf16.vlgmr.msra.gmra.mrb[0].mxu1 %v320_v41  ;;  %1394 = vmatprep.subr.bf16.mxu0 %v1579_v42  ;;  %v1600_v41 = vld [vmem:[%s2088_s3 + $0x30] sm:$0xff]   ;;  %v1601_v42 = vld [vmem:[%s2088_s3 + $0x38] sm:$0xff]  }
  0x7f   : > { %1436 = vmatprep.mubr.msk.bf16.mxu1 %vm1745_vm0, %v1744_v44  ;;  %1435 = vmatpush3.bf16.msra.mxu1 %v1593_v53  ;;  %v1320_v53 = vld [vmem:[%s2089_s4] ss:$0 sm:$0xff] }
  0x80   : > { %1440 = vmatprep.subr.bf16.mxu1 %v1744_v44 }
  0x81   : > { %1395 = vmatpush3.bf16.msra.mxu0 %v1580_v43 }
  0x82   : > { %1396 = vmatprep.subr.bf16.mxu0 %v1581_v45 }
  0x85   : > { %1397 = vmatpush3.bf16.msra.mxu0 %v1582_v46 }
  0x86   : > { %1398 = vmatprep.subr.bf16.mxu0 %v1583_v47  ;;  %1437 = vmatmul.mubr.msk.bf16.vlgmr.msra.gmra.mrb[4].mxu1 %vm727_vm1, %v324_v58 }
  0x87   : > { %1456 = vmatprep.mubr.msk.bf16.mxu1 %vm1745_vm0, %v1744_v44  ;;  %1441 = vmatpush3.bf16.msra.mxu1 %v1594_v27 }
  0x88   : > { %1442 = vmatprep.subr.bf16.mxu1 %v1744_v44 }
  0x89   : > { %1399 = vmatpush3.bf16.msra.mxu0 %v1584_v48 }
  0x8a   : > { %1400 = vmatprep.subr.bf16.mxu0 %v1585_v49 }
  0x8b   : > { %1443 = vmatpush3.bf16.msra.mxu1 %v1595_v28 }
  0x8c   : > { %1444 = vmatprep.subr.bf16.mxu1 %v1744_v44 }
  0x8d   : > { %1401 = vmatpush3.bf16.msra.mxu0 %v1586_v50 }
  0x8e   : > { %1402 = vmatprep.subr.bf16.mxu0 %v1587_v51 }
  0x8f   : > { %1445 = vmatpush3.bf16.msra.mxu1 %v1596_v29 }
  0x90   : > { %1446 = vmatprep.subr.bf16.mxu1 %v1744_v44 }
  0x91   : > { %1403 = vmatpush3.bf16.msra.mxu0 %v1588_v52 }
  0x92   : > { %1404 = vmatprep.subr.bf16.mxu0 %v1589_v55 }
  0x93   : > { %1447 = vmatpush3.bf16.msra.mxu1 %v1597_v30 }
  0x94   : > { %1448 = vmatprep.subr.bf16.mxu1 %v1744_v44 }
  0x95   : > { %1405 = vmatpush3.bf16.msra.mxu0 %v1590_v59 }
  0x96   : > { %1406 = vmatprep.subr.bf16.mxu0 %v1591_v60  ;;  %v1602_v60 = vld [vmem:[%s2090_s5] sm:$0xff]  }
  0x97   : > { %1449 = vmatpush3.bf16.msra.mxu1 %v1598_v31 }
  0x98   : > { %1450 = vmatprep.subr.bf16.mxu1 %v1744_v44 }
  0x99   : > { %1407 = vmatpush3.bf16.msra.mxu0 %v1592_v61  ;;  %v1603_v61 = vld [vmem:[%s2090_s5 + $0x8] sm:$0xff]  }
  0x9a   : > { %1460 = vmatprep.subr.bf16.mxu0 %v1744_v44 }
  0x9b   : > { %1451 = vmatpush3.bf16.msra.mxu1 %v1599_v40 }
  0x9c   : > { %844 = vmatmul.mubr.bf16.vlgmr.msra.gmra.mrb[4].mxu0 %v322_v63  ;;  %1452 = vmatprep.subr.bf16.mxu1 %v1744_v44  ;;  %v1605_v63 = vld [vmem:[%s2090_s5 + $0x18] sm:$0xff]  }
  0x9d   : > { %1476 = vmatprep.mubr.msk.bf16.mxu0 %vm1745_vm0, %v1744_v44  ;;  %1461 = vmatpush3.bf16.msra.mxu0 %v1602_v60 }
  0x9e   : > { %1462 = vmatprep.subr.bf16.mxu0 %v1744_v44 }
  0x9f   : > { %1453 = vmatpush3.bf16.msra.mxu1 %v1600_v41 }
  0xa0   : > { %1454 = vmatprep.subr.bf16.mxu1 %v1744_v44 }
  0xa1   : > { %1463 = vmatpush3.bf16.msra.mxu0 %v1603_v61 }
  0xa2   : > { %1464 = vmatprep.subr.bf16.mxu0 %v1744_v44 }
  0xa3   : > { %1455 = vmatpush3.bf16.msra.mxu1 %v1601_v42 }
  0xa5   : > { %1465 = vmatpush3.bf16.msra.mxu0 %v1604_v62 }
  0xa6   : > { %1466 = vmatprep.subr.bf16.mxu0 %v1744_v44 }
  0xa9   : > { %1467 = vmatpush3.bf16.msra.mxu0 %v1605_v63 }
  0xaa   : > { %1468 = vmatprep.subr.bf16.mxu0 %v1744_v44 }
 0x14f   : > { %v1364_v0 = vpop.f32.mrb[0].mxu0 }
 0x150   : > { %v1365_v2 = vpop.f32.mrb[1].mxu0 }
 0x151   : > { %v1366_v3 = vadd.f32 %v1365_v2, %v1364_v0  ;;  %v1367_v4 = vpop.f32.mrb[2].mxu0  ;;  %v1386_v5 = vpop.f32.mrb[0].mxu1  ;;  %v1606_v0 = vld [vmem:[%s2090_s5 + $0x20] sm:$0xff]  }
 0x152   : > { %v1368_v6 = vpop.f32.mrb[3].mxu0  ;;  %v1387_v8 = vpop.f32.mrb[1].mxu1  ;;  %1469 = vmatpush3.bf16.msra.mxu0 %v1606_v0 }
 0x153   : > { %v766_v7 = vadd.f32 %v1366_v3, %v1269_v1  ;;  %v1388_v9 = vadd.f32 %v1387_v8, %v1386_v5  ;;  %v1389_v10 = vpop.f32.mrb[2].mxu1  ;;  %1470 = vmatprep.subr.bf16.mxu0 %v1744_v44  ;;  %v1607_v8 = vld [vmem:[%s2090_s5 + $0x28] sm:$0xff]  }
 0x154   : > { %v1390_v11 = vpop.f32.mrb[3].mxu1  ;;  %v1609_v10 = vld [vmem:[%s2090_s5 + $0x38] sm:$0xff]  }
 0x155   : > { %v806_v12 = vadd.f32 %v1388_v9, %v766_v7  ;;  %v1608_v9 = vld [vmem:[%s2090_s5 + $0x30] sm:$0xff]  }
 0x156   : > { %1471 = vmatpush3.bf16.msra.mxu0 %v1607_v8 }
 0x157   : > { %1472 = vmatprep.subr.bf16.mxu0 %v1744_v44 }
 0x159   : > { %v885_v13 = vpop.f32.mrb[4].mxu1 }
 0x15a   : > { %v1438_v14 = vpop.f32.mrb[5].mxu1  ;;  %1473 = vmatpush3.bf16.msra.mxu0 %v1608_v9 }
 0x15b   : > { %v888_v15 = vpop.f32.mrb[6].mxu1  ;;  %1474 = vmatprep.subr.bf16.mxu0 %v1744_v44  ;;  %v1332_v44 = vld [vmem:[%s2091_s6] ss:$0 sm:$0xff] }
 0x15c   : > { %v1439_v16 = vpop.f32.mrb[7].mxu1 }
 0x15e   : > { %1475 = vmatpush3.bf16.msra.mxu0 %v1609_v10 }
 0x16f   : > { %v1408_v18 = vpop.f32.mrb[4].mxu0 }
 0x170   : > { %v1409_v19 = vpop.f32.mrb[5].mxu0 }
 0x171   : > { %v1410_v21 = vadd.f32 %v1409_v19, %v1408_v18  ;;  %v1411_v22 = vpop.f32.mrb[6].mxu0 }
 0x172   : > { %v1412_v23 = vpop.f32.mrb[7].mxu0 }
 0x173   : > { %v846_v24 = vadd.f32 %v1410_v21, %v806_v12 }
 0x175   : > { %v886_v25 = vadd.f32 %v885_v13, %v846_v24 }
 0x177   : > { %v891_v26 = vsel %vm327_vm2, %v886_v25, 3e+38  ;;  %v1330_v52 = vpack.c.bf16 %v886_v25, %v886_v25 }
 0x178   : > { %892 = vmin.xlane.f32.xlu0 %v891_v26 }
 0x205   : > { %v893_v32 = vpop.xlane.xlu0 %892 }
 0x206   : > { %vm894_vm3 = vcmp.le.f32.partialorder %v891_v26, %v893_v32 }
 0x207   : > { %v895_v34 = vsel %vm894_vm3, 1, %v1746_v33  ;;  %v908_v39 = vsel %vm894_vm3, 3e+38, %v891_v26 }
 0x208   : > { %v897_v35 = vshrl.u32 %v895_v34, 16  ;;  %v896_v36 = vand.u32 65535, %v895_v34 }
 0x20a   : > { %v899_v37 = vcvt.s32.f32 %v897_v35  ;;  %v898_v38 = vcvt.s32.f32 %v896_v36 }
 0x20c   : > { %902 = vadd.xlane.f32.xlu0 %v899_v37  ;;  %900 = vadd.xlane.f32.xlu1 %v898_v38 }
 0x210   : > { %909 = vmin.xlane.f32.xlu1 %v908_v39 }
 0x299   : > { %v903_v43 = vpop.xlane.xlu0 %902  ;;  %v901_v45 = vpop.xlane.xlu1 %900 }
 0x29a   : > { %v905_v46 = vcvt.f32.s32 %v903_v43  ;;  %v904_v48 = vcvt.f32.s32 %v901_v45 }
 0x29c   : > { %v906_v47 = vshll.u32 %v905_v46, 16 }
 0x29d   : > { %v910_v50 = vpop.xlane.xlu1 %909 }
 0x29e   : > { %v907_v49 = vadd.s32 %v906_v47, %v904_v48 }
 0x2a0   : > { %vm911_vm4 = vcmp.gt.s32.totalorder %v907_v49, 1 }
 0x2a1   : > { %v912_v51 = vsel %vm911_vm4, %v893_v32, %v910_v50 }
 0x2a2   : > { %vm913_vm5 = vcmp.ge.f32.partialorder %v886_v25, %v912_v51 }
 0x2a3   : > { %vm914_vm6 = vmand %vm913_vm5, %vm327_vm2 }
 0x2a4   : > { %vm1329_vm7 = vmpackc.low %vm914_vm6, %vm914_vm6 }
 0x2a5   : > { %1457 = vmatmul.mubr.msk.bf16.vlgmr.msra.gmra.mrb[8].mxu1 %vm1329_vm7, %v1330_v52 }
 0x378   : > { %v1022_v54 = vpop.f32.mrb[8].mxu1 }
 0x379   : > { %v1023_v55 = vadd.f32 %v1320_v53, %v1022_v54  ;;  %v1458_v56 = vpop.f32.mrb[9].mxu1 }
 0x37a   : > { %v1025_v57 = vpop.f32.mrb[10].mxu1 }
 0x37b   : > { %v1459_v58 = vpop.f32.mrb[11].mxu1  ;;  %v1028_v59 = vsel %vm327_vm2, %v1023_v55, 3e+38  ;;  %v1342_v19 = vpack.c.bf16 %v1023_v55, %v1023_v55 }
 0x37c   : > { %1029 = vmin.xlane.f32.xlu0 %v1028_v59 }
 0x409   : > { %v1030_v1 = vpop.xlane.xlu0 %1029 }
 0x40a   : > { %vm1031_vm8 = vcmp.le.f32.partialorder %v1028_v59, %v1030_v1 }
 0x40b   : > { %v1032_v2 = vsel %vm1031_vm8, 1, %v1746_v33  ;;  %v1045_v7 = vsel %vm1031_vm8, 3e+38, %v1028_v59 }
 0x40c   : > { %v1034_v3 = vshrl.u32 %v1032_v2, 16  ;;  %v1033_v4 = vand.u32 65535, %v1032_v2 }
 0x40e   : > { %v1036_v5 = vcvt.s32.f32 %v1034_v3  ;;  %v1035_v6 = vcvt.s32.f32 %v1033_v4 }
 0x410   : > { %1039 = vadd.xlane.f32.xlu1 %v1036_v5  ;;  %1037 = vadd.xlane.f32.xlu0 %v1035_v6 }
 0x414   : > { %1046 = vmin.xlane.f32.xlu1 %v1045_v7 }
 0x49d   : > { %v1040_v11 = vpop.xlane.xlu1 %1039  ;;  %v1038_v12 = vpop.xlane.xlu0 %1037 }
 0x49e   : > { %v1042_v13 = vcvt.f32.s32 %v1040_v11  ;;  %v1041_v15 = vcvt.f32.s32 %v1038_v12 }
 0x4a0   : > { %v1043_v14 = vshll.u32 %v1042_v13, 16 }
 0x4a1   : > { %v1047_v17 = vpop.xlane.xlu1 %1046 }
 0x4a2   : > { %v1044_v16 = vadd.s32 %v1043_v14, %v1041_v15 }
 0x4a4   : > { %vm1048_vm9 = vcmp.gt.s32.totalorder %v1044_v16, 1 }
 0x4a5   : > { %v1049_v18 = vsel %vm1048_vm9, %v1030_v1, %v1047_v17 }
 0x4a6   : > { %vm1050_vm10 = vcmp.ge.f32.partialorder %v1023_v55, %v1049_v18 }
 0x4a7   : > { %vm1051_vm11 = vmand %vm1050_vm10, %vm327_vm2 }
 0x4a8   : > { %vm1341_vm12 = vmpackc.low %vm1051_vm11, %vm1051_vm11 }
 0x4a9   : > { %1477 = vmatmul.mubr.msk.bf16.vlgmr.msra.gmra.mrb[8].mxu0 %vm1341_vm12, %v1342_v19 }
 0x57c   : > { %v1159_v21 = vpop.f32.mrb[8].mxu0 }
 0x57d   : > { %v1160_v22 = vadd.f32 %v1332_v44, %v1159_v21  ;;  %v1478_v23 = vpop.f32.mrb[9].mxu0 }
 0x57e   : > { %v1162_v20 = vpop.f32.mrb[10].mxu0 }
 0x57f   : > { %v1479_v24 = vpop.f32.mrb[11].mxu0  ;;  %1166 = vst.msk [vmem:[%s309_s21] sm:$0xff] %vm1165_vm13, %v1160_v22 }
 0x580   : > { %1681 = shalt.err (!%p1678_p7)
}
 0x581   : > { %s1682_s16 = scalar_lea.hbm %s2041_s12, 128  ;;  %s1686_s23 = scalar_lea.hbm %s2092_s7, 256 }
 0x582   : > { %p1683_p9 = scmp.ne.s32.totalorder %s2041_s12, %s1682_s16  ;;  %p1687_p0 = scmp.lt.u32.totalorder %s2041_s12, %s2092_s7 }
 0x583   : > { %p1688_p13 = scmp.lt.u32.totalorder %s1686_s23, %s1682_s16  ;;  %p1690_p4 = scmp.lt.u32.totalorder %s1682_s16, %s2041_s12 }
 0x584   : > { %p1684_p2 = pnand %p1683_p9, %p1879_p12 }
 0x585   : > { %p1689_p1 = por %p1688_p13, %p1687_p0 }
 0x586   : > { %p1685_p5 = pneg %p1684_p2 }
 0x587   : > { %p1691_p6 = por %p1690_p4, %p1689_p1 }
 0x589   : > { %p1692_p8 = pnand %p1691_p6, %p1685_p5 }
 0x58b   : > { %1695 = shalt.err (!%p1692_p8)
}
 0x58c   : > { %1489 = dma.vmem_to_hbm [thread:$0]  (%p1879_p12), %s2043_s11, 128, %s2041_s12, %s1168_s28  }
 0x58d PF: > { %s1193_s21 = sand.u32 1, %s1726_s24   ;;  %p2109_p10 = scmp.ne.s32.totalorder %s2098_s8, 0 }
 0x58e   : > { %p2110_p11 = scmp.ge.s32.totalorder %s1738_s27, 2  ;;  %s1194_s30 = scalar_lea.sflag [#allocation4], %s1193_s21 }
 0x590   : > { %p1500_p3 = pnand %p2110_p11, %p2109_p10 }
 0x592   : > { %1721 = dma.done.wait (!%p1500_p3), %s1194_s30, 128  }
 0x593   : > { %1723 = vsyncadd (!%p1500_p3), %s1194_s30, 4294967168  ;;  %p21_p7 = scmp.ge.s32.totalorder %s1844_s13, 4   ;;  %s2111_s24 = smov %s1730_s25 }
 0x594   : > { %s2112_s25 = smov %s1734_s26  ;;  %s2113_s26 = smov %s1875_s18 }
 0x595   : > { %s2114_s27 = smov %s1844_s13  ;;  %23 = sbr.rel (!%p21_p7) target bundleno = 8 (0x8), region = 97 }
 0x59c   :  { %1199 = vsyncpa [#allocation3], 1 }
 0x59d   :  { %1201 = vsyncpa [#allocation3 + $0x1], 1 }
 0x59e   :  { %1202 = vsyncpa [#allocation6], 1 }
 0x59f   :  { %1203 = vsyncpa [#allocation4], 1 }
 0x5a0   :  { %1205 = vsyncpa [#allocation4 + $0x1], 1 }

</bundles_post_ra>
